<compile_context>
chip_gen: v6e
topology: v6e:2x2x1
jax: 0.10.0
libtpu: 0.0.40
codegen_flags: <defaults>
</compile_context>

<pallas_src>
import functools

import jax
import jax.numpy as jnp
from jax.experimental import pallas as pl
from jax.experimental.pallas import tpu as pltpu


TILE_N = 128  # lane width; correct for v5e MXU, fine on v6e/v7x


def _round_up(x, m):
    return (x + m - 1) // m * m


def _k_tiling(K):
    """Return (tile_K, K_padded).  Single K-step when small, capped at 512."""
    kp = _round_up(K, 128)
    if kp <= 1024:
        return kp, kp
    return 512, _round_up(K, 512)


# ----------------------------------------------------------------------------
# Pallas kernels
# ----------------------------------------------------------------------------
def _matmul_bn_act_kernel(*refs, apply_relu, add_identity):
    # grid = (M_tiles, N_tiles, K_tiles); K is the reduction ("arbitrary") axis.
    if add_identity:
        p_ref, w_ref, s_ref, b_ref, id_ref, o_ref, acc_ref = refs
    else:
        p_ref, w_ref, s_ref, b_ref, o_ref, acc_ref = refs
        id_ref = None

    @pl.when(pl.program_id(2) == 0)
    def _init():
        acc_ref[...] = jnp.zeros_like(acc_ref)

    acc_ref[...] += jnp.dot(p_ref[...], w_ref[...],
                            preferred_element_type=jnp.float32)

    @pl.when(pl.program_id(2) == pl.num_programs(2) - 1)
    def _finalize():
        y = acc_ref[...] * s_ref[...] + b_ref[...]
        if add_identity:
            y = y + id_ref[...]
        if apply_relu:
            y = jnp.maximum(y, 0.0)
        o_ref[...] = y.astype(o_ref.dtype)


def matmul_bn_act(patches, p, apply_relu, identity=None):
    """(M, K) bf16 @ (K, N_pad) bf16 -> f32, fused BN (+identity) (+ReLU)."""
    M, K = patches.shape
    wmat, scale, bias = p["wmat"], p["scale"], p["bias"]
    K_pad, N_pad = wmat.shape
    cout = p["cout"]

    tn = TILE_N
    tm = min(256, _round_up(M, 16))
    M_pad = _round_up(M, tm)
    tk = K_pad if K_pad <= 1024 else 512  # matches _k_tiling used at prep time

    patches_p = jnp.pad(patches, ((0, M_pad - M), (0, K_pad - K)))

    add_identity = identity is not None
    in_specs = [
        pl.BlockSpec((tm, tk), lambda i, j, k: (i, k)),
        pl.BlockSpec((tk, tn), lambda i, j, k: (k, j)),
        pl.BlockSpec((1, tn), lambda i, j, k: (0, j)),
        pl.BlockSpec((1, tn), lambda i, j, k: (0, j)),
    ]
    args = [patches_p, wmat, scale, bias]
    if add_identity:
        ident_p = jnp.pad(identity, ((0, M_pad - M), (0, N_pad - cout)))
        in_specs.append(pl.BlockSpec((tm, tn), lambda i, j, k: (i, j)))
        args.append(ident_p)

    grid = (M_pad // tm, N_pad // tn, K_pad // tk)
    flops = 2 * M_pad * K_pad * N_pad
    bytes_accessed = (patches_p.size * 2 + wmat.size * 2
                      + M_pad * N_pad * 4
                      + (M_pad * N_pad * 4 if add_identity else 0))

    kernel = functools.partial(_matmul_bn_act_kernel,
                               apply_relu=apply_relu,
                               add_identity=add_identity)
    out = pl.pallas_call(
        kernel,
        out_shape=jax.ShapeDtypeStruct((M_pad, N_pad), jnp.float32),
        grid_spec=pltpu.PrefetchScalarGridSpec(
            num_scalar_prefetch=0,
            grid=grid,
            in_specs=in_specs,
            out_specs=pl.BlockSpec((tm, tn), lambda i, j, k: (i, j)),
            scratch_shapes=[pltpu.VMEM((tm, tn), jnp.float32)],
        ),
        compiler_params=pltpu.CompilerParams(
            dimension_semantics=("parallel", "parallel", "arbitrary"),
            vmem_limit_bytes=32 * 1024 * 1024,
        ),
        cost_estimate=pl.CostEstimate(
            flops=flops, transcendentals=0, bytes_accessed=bytes_accessed),
    )(*args)
    return out[:M, :cout]


def _maxpool_kernel(p_ref, o_ref):
    # p_ref: (9, tile_M, C) shifted windows; reduce max over the window axis.
    o_ref[...] = jnp.max(p_ref[...], axis=0)


# ----------------------------------------------------------------------------
# Plain-JAX glue: im2col patch extraction, padding, reshapes
# ----------------------------------------------------------------------------
def _extract_patches(x_nhwc, kh, kw, stride, padding, pad_value=0.0):
    """Return (N, Ho, Wo, KH*KW, C) shifted windows (pure data rearrangement)."""
    N, H, W, C = x_nhwc.shape
    xp = jnp.pad(
        x_nhwc,
        ((0, 0), (padding, padding), (padding, padding), (0, 0)),
        constant_values=pad_value,
    )
    Ho = (H + 2 * padding - kh) // stride + 1
    Wo = (W + 2 * padding - kw) // stride + 1
    cols = []
    for i in range(kh):
        for j in range(kw):
            cols.append(xp[:, i:i + Ho * stride:stride, j:j + Wo * stride:stride, :])
    patches = jnp.stack(cols, axis=3)  # (N, Ho, Wo, KH*KW, C)
    return patches, Ho, Wo


def conv_bn_act(x_nhwc, p, stride, padding, relu=True, identity=None):
    """Conv2d + folded BN + optional fused residual add + optional ReLU."""
    kh, kw, cin, cout = p["kh"], p["kw"], p["cin"], p["cout"]
    N = x_nhwc.shape[0]
    xb = x_nhwc.astype(jnp.bfloat16)  # bf16 MXU inputs; accumulate stays f32
    if kh == 1 and kw == 1:
        if stride != 1:
            xb = xb[:, ::stride, ::stride, :]
        Ho, Wo = xb.shape[1], xb.shape[2]
        patches = xb.reshape(N * Ho * Wo, cin)
    else:
        patches, Ho, Wo = _extract_patches(xb, kh, kw, stride, padding)
        patches = patches.reshape(N * Ho * Wo, kh * kw * cin)
    ident2d = None
    if identity is not None:
        ident2d = identity.astype(jnp.float32).reshape(N * Ho * Wo, cout)
    out = matmul_bn_act(patches, p, apply_relu=relu, identity=ident2d)
    return out.reshape(N, Ho, Wo, cout)


def maxpool_3x3_s2_p1(x_nhwc):
    N, H, W, C = x_nhwc.shape
    patches, Ho, Wo = _extract_patches(x_nhwc, 3, 3, 2, 1, pad_value=-jnp.inf)
    M = N * Ho * Wo
    patches = jnp.transpose(patches, (3, 0, 1, 2, 4)).reshape(9, M, C)
    tm = min(256, _round_up(M, 8))
    M_pad = _round_up(M, tm)
    patches = jnp.pad(patches, ((0, 0), (0, M_pad - M), (0, 0)),
                      constant_values=-jnp.inf)
    out = pl.pallas_call(
        _maxpool_kernel,
        out_shape=jax.ShapeDtypeStruct((M_pad, C), jnp.float32),
        grid=(M_pad // tm,),
        in_specs=[pl.BlockSpec((9, tm, C), lambda i: (0, i, 0))],
        out_specs=pl.BlockSpec((tm, C), lambda i: (i, 0)),
        compiler_params=pltpu.CompilerParams(
            dimension_semantics=("parallel",)),
    )(patches)
    return out[:M].reshape(N, Ho, Wo, C)


# ----------------------------------------------------------------------------
# Bottleneck block and full Resnet forward
# ----------------------------------------------------------------------------
def bottleneck_forward(x_nhwc, blk):
    stride = blk["stride"]
    out = conv_bn_act(x_nhwc, blk["conv1"], stride=1, padding=0, relu=True)
    out = conv_bn_act(out, blk["conv2"], stride=stride, padding=1, relu=True)
    if "downsample" in blk:
        identity = conv_bn_act(x_nhwc, blk["downsample"], stride=stride,
                               padding=0, relu=False)
    else:
        identity = x_nhwc
    # conv3 + BN + residual add + ReLU fused into a single Pallas kernel.
    out = conv_bn_act(out, blk["conv3"], stride=1, padding=0, relu=True,
                      identity=identity)
    return out


def resnet_forward(params, x_nchw, return_feature_maps=False):
    # NCHW -> NHWC once at the boundary.
    x = jnp.transpose(x_nchw, (0, 2, 3, 1)).astype(jnp.float32)
    conv_out = []
    x = conv_bn_act(x, params["conv1"], stride=2, padding=1, relu=True)
    x = conv_bn_act(x, params["conv2"], stride=1, padding=1, relu=True)
    x = conv_bn_act(x, params["conv3"], stride=1, padding=1, relu=True)
    x = maxpool_3x3_s2_p1(x)
    for layer_blocks in params["layers"]:
        for blk in layer_blocks:
            x = bottleneck_forward(x, blk)
        conv_out.append(jnp.transpose(x, (0, 3, 1, 2)))  # back to NCHW
    if return_feature_maps:
        return conv_out
    return [conv_out[-1]]


# ----------------------------------------------------------------------------
# Parameter construction (shapes follow the module), kernel-ready layout
# ----------------------------------------------------------------------------
def _prep_conv(w, scale, bias):
    """Pre-transpose/pad/bf16-cast weights once: (Cout,Cin,KH,KW) -> (K_pad,N_pad)."""
    cout, cin, kh, kw = w.shape
    K = kh * kw * cin
    _, K_pad = _k_tiling(K)
    N_pad = _round_up(cout, TILE_N)
    wmat = jnp.transpose(w, (2, 3, 1, 0)).reshape(K, cout)
    wmat = jnp.pad(wmat, ((0, K_pad - K), (0, N_pad - cout))).astype(jnp.bfloat16)
    scale_p = jnp.pad(scale.reshape(1, cout), ((0, 0), (0, N_pad - cout)))
    bias_p = jnp.pad(bias.reshape(1, cout), ((0, 0), (0, N_pad - cout)))
    return {"wmat": wmat, "scale": scale_p, "bias": bias_p,
            "kh": kh, "kw": kw, "cin": cin, "cout": cout}


def init_conv_bn(key, cin, cout, k):
    kwk, kg, kb, km, kv = jax.random.split(key, 5)
    fan_in = float(k * k * cin)
    w = jax.random.normal(kwk, (cout, cin, k, k), jnp.float32) / jnp.sqrt(fan_in)
    gamma = 1.0 + 0.1 * jax.random.normal(kg, (cout,), jnp.float32)
    beta = 0.1 * jax.random.normal(kb, (cout,), jnp.float32)
    mean = 0.1 * jax.random.normal(km, (cout,), jnp.float32)
    var = 1.0 + 0.1 * jax.random.uniform(kv, (cout,), jnp.float32)
    eps = 1e-5
    scale = gamma / jnp.sqrt(var + eps)
    bias = beta - mean * scale
    return _prep_conv(w, scale, bias)


def build_params(key):
    # Small synthetic ResNet: deep stem 3->8->8->16, bottleneck stages with
    # planes [8,16,32,64], expansion 4, one block per stage, strides [1,2,2,2].
    keys = iter(jax.random.split(key, 64))
    params = {
        "conv1": init_conv_bn(next(keys), 3, 8, 3),
        "conv2": init_conv_bn(next(keys), 8, 8, 3),
        "conv3": init_conv_bn(next(keys), 8, 16, 3),
    }
    expansion = 4
    planes_list = [8, 16, 32, 64]
    strides = [1, 2, 2, 2]
    blocks_per_layer = [1, 1, 1, 1]
    inplanes = 16
    layers = []
    for planes, stride, nblocks in zip(planes_list, strides, blocks_per_layer):
        blocks = []
        for b in range(nblocks):
            s = stride if b == 0 else 1
            blk = {
                "stride": s,
                "conv1": init_conv_bn(next(keys), inplanes, planes, 1),
                "conv2": init_conv_bn(next(keys), planes, planes, 3),
                "conv3": init_conv_bn(next(keys), planes, planes * expansion, 1),
            }
            if s != 1 or inplanes != planes * expansion:
                blk["downsample"] = init_conv_bn(
                    next(keys), inplanes, planes * expansion, 1)
            blocks.append(blk)
            inplanes = planes * expansion
        layers.append(blocks)
    params["layers"] = layers
    return params


if __name__ == "__main__":
    key = jax.random.PRNGKey(0)
    kp, kx = jax.random.split(key)
    params = build_params(kp)
    x = jax.random.normal(kx, (2, 3, 32, 32), jnp.float32)  # NCHW like PyTorch

    feats = resnet_forward(params, x, return_feature_maps=True)
    final = resnet_forward(params, x, return_feature_maps=False)

    for f in feats:
        jax.block_until_ready(f)
    jax.block_until_ready(final[0])

    # Expected NCHW shapes: (2,32,8,8), (2,64,4,4), (2,128,2,2), (2,256,1,1)
    assert [tuple(f.shape) for f in feats] == [
        (2, 32, 8, 8), (2, 64, 4, 4), (2, 128, 2, 2), (2, 256, 1, 1)]
    assert tuple(final[0].shape) == (2, 256, 1, 1)
    print("KERNEL_OK")
</pallas_src>

<mosaic_0001>
module attributes {stable_mosaic.version = 11 : i64} {
  func.func @_matmul_bn_act_kernel(%arg0: i32, %arg1: i32, %arg2: i32, %arg3: memref<256x128xbf16, #tpu.memory_space<vmem>>, %arg4: memref<128x128xbf16, #tpu.memory_space<vmem>>, %arg5: memref<1x128xf32, #tpu.memory_space<vmem>>, %arg6: memref<1x128xf32, #tpu.memory_space<vmem>>, %arg7: memref<256x128xf32, #tpu.memory_space<vmem>>, %arg8: memref<256x128xf32, #tpu.memory_space<vmem>>) attributes {dimension_semantics = [#tpu.dimension_semantics<parallel>, #tpu.dimension_semantics<parallel>, #tpu.dimension_semantics<arbitrary>], iteration_bounds = array<i64: 2, 1, 1>, scalar_prefetch = 0 : i64, scratch_operands = 1 : i64, tpu.core_type = #tpu.core_type<tc>, window_params = [{transform_indices = @transform_0, window_bounds = array<i64: 256, 128>}, {transform_indices = @transform_1, window_bounds = array<i64: 128, 128>}, {transform_indices = @transform_2, window_bounds = array<i64: 1, 128>}, {transform_indices = @transform_3, window_bounds = array<i64: 1, 128>}, {transform_indices = @transform_4, window_bounds = array<i64: 256, 128>}]} {
    %c0_i32 = arith.constant 0 : i32
    %0 = arith.cmpi eq, %arg2, %c0_i32 : i32
    %1 = arith.extui %0 : i1 to i32
    %c0_i32_0 = arith.constant 0 : i32
    %2 = arith.cmpi ne, %1, %c0_i32_0 : i32
    scf.if %2 {
      %cst_10 = arith.constant 0.000000e+00 : f32
      %12 = vector.broadcast %cst_10 : f32 to vector<256x128xf32>
      %c0_11 = arith.constant 0 : index
      %c0_12 = arith.constant 0 : index
      %13 = vector.load %arg8[%c0_11, %c0_12] : memref<256x128xf32, #tpu.memory_space<vmem>>, vector<256x128xf32>
      tpu.vector_store %arg8[%c0_11, %c0_12], %12 {strides = array<i32>} : memref<256x128xf32, #tpu.memory_space<vmem>>, vector<256x128xf32>,
    } else {
    }
    %c0 = arith.constant 0 : index
    %c0_1 = arith.constant 0 : index
    %3 = vector.load %arg8[%c0, %c0_1] : memref<256x128xf32, #tpu.memory_space<vmem>>, vector<256x128xf32>
    %c0_2 = arith.constant 0 : index
    %c0_3 = arith.constant 0 : index
    %4 = vector.load %arg3[%c0_2, %c0_3] : memref<256x128xbf16, #tpu.memory_space<vmem>>, vector<256x128xbf16>
    %c0_4 = arith.constant 0 : index
    %c0_5 = arith.constant 0 : index
    %5 = vector.load %arg4[%c0_4, %c0_5] : memref<128x128xbf16, #tpu.memory_space<vmem>>, vector<128x128xbf16>
    %cst = arith.constant dense<0.000000e+00> : vector<256x128xf32>
    %6 = tpu.matmul %4, %5, %cst {dimension_numbers = #tpu.dot_dimension_numbers<[1], [0], [0], [1], [0, 0, 1, 1], [], []>} : vector<256x128xbf16>, vector<128x128xbf16>, vector<256x128xf32> -> vector<256x128xf32>
    %7 = arith.addf %3, %6 : vector<256x128xf32>
    %c0_6 = arith.constant 0 : index
    %c0_7 = arith.constant 0 : index
    %8 = vector.load %arg8[%c0_6, %c0_7] : memref<256x128xf32, #tpu.memory_space<vmem>>, vector<256x128xf32>
    tpu.vector_store %arg8[%c0_6, %c0_7], %7 {strides = array<i32>} : memref<256x128xf32, #tpu.memory_space<vmem>>, vector<256x128xf32>,
    %c0_i32_8 = arith.constant 0 : i32
    %9 = arith.cmpi eq, %arg2, %c0_i32_8 : i32
    %10 = arith.extui %9 : i1 to i32
    %c0_i32_9 = arith.constant 0 : i32
    %11 = arith.cmpi ne, %10, %c0_i32_9 : i32
    scf.if %11 {
      %c0_10 = arith.constant 0 : index
      %c0_11 = arith.constant 0 : index
      %12 = vector.load %arg8[%c0_10, %c0_11] : memref<256x128xf32, #tpu.memory_space<vmem>>, vector<256x128xf32>
      %c0_12 = arith.constant 0 : index
      %c0_13 = arith.constant 0 : index
      %13 = vector.load %arg5[%c0_12, %c0_13] : memref<1x128xf32, #tpu.memory_space<vmem>>, vector<1x128xf32>
      %14 = vector.broadcast %13 : vector<1x128xf32> to vector<256x128xf32>
      %15 = arith.mulf %12, %14 : vector<256x128xf32>
      %c0_14 = arith.constant 0 : index
      %c0_15 = arith.constant 0 : index
      %16 = vector.load %arg6[%c0_14, %c0_15] : memref<1x128xf32, #tpu.memory_space<vmem>>, vector<1x128xf32>
      %17 = vector.broadcast %16 : vector<1x128xf32> to vector<256x128xf32>
      %18 = arith.addf %15, %17 : vector<256x128xf32>
      %cst_16 = arith.constant 0.000000e+00 : f32
      %19 = vector.broadcast %cst_16 : f32 to vector<256x128xf32>
      %20 = arith.maximumf %18, %19 : vector<256x128xf32>
      %c0_17 = arith.constant 0 : index
      %c0_18 = arith.constant 0 : index
      %21 = vector.load %arg7[%c0_17, %c0_18] : memref<256x128xf32, #tpu.memory_space<vmem>>, vector<256x128xf32>
      tpu.vector_store %arg7[%c0_17, %c0_18], %20 {strides = array<i32>} : memref<256x128xf32, #tpu.memory_space<vmem>>, vector<256x128xf32>,
    } else {
    }
    return
  }
  func.func @transform_0(%arg0: i32, %arg1: i32, %arg2: i32) -> (i32, i32) {
    %c0_i32 = arith.constant 0 : i32
    return %arg0, %arg2 : i32, i32
  }
  func.func @transform_1(%arg0: i32, %arg1: i32, %arg2: i32) -> (i32, i32) {
    %c0_i32 = arith.constant 0 : i32
    return %arg2, %arg1 : i32, i32
  }
  func.func @transform_2(%arg0: i32, %arg1: i32, %arg2: i32) -> (i32, i32) {
    %c0_i32 = arith.constant 0 : i32
    %c0_i32_0 = arith.constant 0 : i32
    return %c0_i32, %arg1 : i32, i32
  }
  func.func @transform_3(%arg0: i32, %arg1: i32, %arg2: i32) -> (i32, i32) {
    %c0_i32 = arith.constant 0 : i32
    %c0_i32_0 = arith.constant 0 : i32
    return %c0_i32, %arg1 : i32, i32
  }
  func.func @transform_4(%arg0: i32, %arg1: i32, %arg2: i32) -> (i32, i32) {
    %c0_i32 = arith.constant 0 : i32
    return %arg0, %arg1 : i32, i32
  }
}

</mosaic_0001>

<bundles_post_ra>
// kernel: tpu_custom_call.1
= control target key start
LH: loop header
LB: loop body
LE: loop exit
PB: predicated region body
PF: predicated region fallthrough
CT: control target
= control target key end

     0   :  { %s1824_s0 = inlined_call_operand.hbm [shape: bf16[512,128], index: 0, kind: input, shape index: {}]   ;;  %s1825_s1 = inlined_call_operand.hbm [shape: bf16[128,128], index: 1, kind: input, shape index: {}]   ;;  %s1826_s2 = inlined_call_operand.vmem [shape: f32[1,128], index: 2, kind: input, shape index: {}]   ;;  %s1827_s3 = inlined_call_operand.vmem [shape: f32[1,128], index: 3, kind: input, shape index: {}]   ;;  %s1828_s4 = inlined_call_operand.hbm [shape: f32[512,128], index: 4, kind: output, shape index: {}]  }
   0x1   :  { %1832 = sst [smem:[#allocation12_spill]] %s1825_s1 }
   0x2   :  { %9 = vsyncpa [#allocation4], 0 }
   0x3   :  { %11 = vsyncpa [#allocation4 + $0x1], 0 }
   0x4   :  { %12 = vsyncpa [#allocation7], 0 }
   0x5   :  { %13 = vsyncpa [#allocation5], 0 }
   0x6   :  { %15 = vsyncpa [#allocation5 + $0x1], 0  ;;  %s1509_s15 = smov 0   ;;  %s1511_s16 = smov 0  }
   0x7   :  { %s1513_s17 = smov 0   ;;  %s1515_s18 = smov 0  }
   0x8   :  { %s1517_s19 = smov 0   ;;  %s1519_s20 = smov 0  }
   0x9 LB: > { %s1101_s21 = sadd.s32 4294967295, %s1475_s20   ;;  %s1102_s22 = sadd.s32 4294967294, %s1475_s20   ;;  %s1475_s20 = sphi %s1519_s20, %s21_s20   ;;  %s1471_s19 = sphi %s1517_s19, %s1852_s19   ;;  %s1467_s18 = sphi %s1515_s18, %s1851_s18   ;;  %s1463_s17 = sphi %s1513_s17, %s1850_s17   ;;  %s1459_s16 = sphi %s1511_s16, %s1849_s16   ;;  %s1455_s15 = sphi %s1509_s15, %s1848_s15  }
   0xa   : > { %p62_p0 = scmp.ne.s32.totalorder %s1459_s16, %s1455_s15  ;;  %p1543_p1 = scmp.eq.s32.totalorder %s1101_s21, 0 }
   0xb   : > { %p1547_p2 = scmp.eq.s32.totalorder %s1101_s21, 1  ;;  %p174_p3 = scmp.eq.s32.totalorder %s1102_s22, 1 }
   0xc   : > { %p1553_p4 = por %p1543_p1, %p62_p0  ;;  %p1103_p5 = scmp.ge.s32.totalorder %s1475_s20, 1 }
   0xd   : > { %p1558_p6 = por %p174_p3, %p62_p0  ;;  %p181_p7 = scmp.lt.s32.totalorder %s1475_s20, 3 }
   0xe   : > { %s1835_s25 = scalar_select %p1553_p4, 1, 0 }
   0xf   : > { %s1836_s26 = scalar_select %p1558_p6, 1, 0 }
  0x10   : > { %p1563_p8 = pnand %p1103_p5, %p181_p7  ;;  %s1477_s28 = smov [#allocation6]  }
  0x11   : > { %s197_s29 = sshll.u32 %s1477_s28, 4  ;;  %s40_s5 = sadd.s32 1, %s1471_s19  ;;  %s198_s29 = int_to_ptr.vmem [resolvable:$true] %s197_s29 }
  0x12   : > { %p1244_p9 = pneg %p1563_p8  ;;  %s1348_s6 = scalar_lea.vmem %s198_s29, 1024 }
  0x13   : > { %p1349_p13 = scmp.ne.s32.totalorder %s198_s29, %s1348_s6  ;;  %p1356_p5 = scmp.lt.s32.totalorder %s198_s29, %s198_s29 }
  0x14   : > { %p1572_p11 = pnand %p1244_p9, %p1543_p1  ;;  %p1357_p7 = scmp.lt.s32.totalorder %s1348_s6, %s1348_s6 }
  0x16   : > { %p1339_p12 = pneg %p1572_p11  ;;  %p1358_p6 = por %p1357_p7, %p1356_p5 }
  0x18   : > { %p1351_p0 = pnand %p1349_p13, %p1339_p12 }
  0x1a   : > { %p1352_p3 = pneg %p1351_p0 }
  0x1c   : > { %p1359_p4 = pnand %p1358_p6, %p1352_p3 }
  0x1e   : > { %1362 = shalt.err (!%p1359_p4)
}
  0x1f   : > { %s1830_s7 = smov 64   ;;  %s1831_s8 = smov 4  }
  0x20   : > { %s1839_s1 = sld [smem:[#allocation12_spill]]  ;;  %p42_p4 = scmp.ge.s32.totalorder %s40_s5, 2 }
  0x21   : > { %s49_s11 = sadd.s32 1, %s1463_s17  ;;  %p56_p6 = scmp.ne.s32.totalorder %s1463_s17, %s1459_s16 }
  0x22   : > { %p57_p9 = scmp.eq.s32.totalorder %s1475_s20, 0  ;;  %s1854_s5 = smov (%p42_p4, %s40_s5), 0 }
  0x23   : > { %p1599_p13 = por %p1547_p2, %p56_p6  ;;  %s44_s14 = ssub.s32 %s1471_s19, %s1854_s5 }
  0x24   : > { %p1593_p12 = por %p57_p9, %p56_p6  ;;  %p1257_p0 = scmp.lt.s32.totalorder %s1475_s20, 2 }
  0x25   : > { %s223_s21 = sand.u32 1, %s1463_s17  }
  0x26   : > { %1247 = dma.hbm_to_vmem [thread:$0]  (!%p1572_p11), %s1839_s1, 1024, %s198_s29, [#allocation7], %s1830_s7, %s1830_s7, %s1831_s8  }
  0x27   : > { %p47_p11 = scmp.eq.s32.totalorder %s44_s14, 0  ;;  %s1108_s22 = sshll.u32 %s223_s21, 7 }
  0x28   : > { %s1146_s29 = sshll.u32 %s1471_s19, 11  ;;  %s227_s10 = scalar_lea.vmem [#allocation3], %s1108_s22 }
  0x29   : > { %s1608_s28 = scalar_select %p47_p11, %s1463_s17, %s49_s11  }
  0x2a   : > { %s234_s9 = scalar_lea.hbm %s1824_s0, %s1146_s29  ;;  %s235_s7 = sshll.u32 %s227_s10, 4  ;;  %s236_s7 = int_to_ptr.vmem [resolvable:$true] %s235_s7 }
  0x2b   : > { %p1616_p2 = pnand %p1257_p0, %p1593_p12  ;;  %s224_s8 = scalar_lea.sflag [#allocation4], %s223_s21 }
  0x2c   : > { %s1376_s14 = scalar_lea.vmem %s236_s7, 2048  ;;  %s1480_s11 = smov [#allocation3]  }
  0x2d   : > { %p1365_p3 = pneg %p1616_p2  ;;  %p1377_p5 = scmp.ne.s32.totalorder %s236_s7, %s1376_s14 }
  0x2e   : > { %s1381_s1 = sshll.u32 %s1480_s11, 4  ;;  %s1382_s1 = int_to_ptr.vmem [resolvable:$false] %s1381_s1 }
  0x2f   : > { %p1379_p7 = pnand %p1377_p5, %p1365_p3  ;;  %s1383_s29 = scalar_lea.vmem %s1382_s1, 4096 }
  0x30   : > { %p1384_p6 = scmp.lt.s32.totalorder %s236_s7, %s1382_s1  ;;  %p1385_p9 = scmp.lt.s32.totalorder %s1383_s29, %s1376_s14 }
  0x31   : > { %p1380_p4 = pneg %p1379_p7 }
  0x32   : > { %p1386_p11 = por %p1385_p9, %p1384_p6 }
  0x34   : > { %p1387_p10 = pnand %p1386_p11, %p1380_p4 }
  0x36   : > { %1390 = shalt.err (!%p1387_p10)
}
  0x37   : > { %s1843_s12 = smov 4   ;;  %s1844_s22 = smov 64  }
  0x38   : > { %1251 = dma.hbm_to_vmem [thread:$0]  (!%p1616_p2), %s234_s9, 2048, %s236_s7, %s224_s8, %s1844_s22, %s1844_s22, %s1843_s12  }
  0x39   : > { %247 = sbr.rel (%p1563_p8) target bundleno = 341 (0x155), region = 36  ;;  %s1630_s21 = sand.u32 (!%p1563_p8), 1, %s1459_s16  }
  0x3a   : > { %s1112_s1 = sshll.u32 (!%p1563_p8), %s1630_s21, 7  ;;  %s250_s30 = scalar_lea.sflag (!%p1563_p8), [#allocation4], %s1630_s21 }
  0x3b   : > { %s1634_s6 = scalar_lea.vmem (!%p1563_p8), [#allocation3], %s1112_s1  ;;  %p1845_p10 = scmp.ne.s32.totalorder (!%p1563_p8), %s1835_s25, 0 }
  0x3e   : > { %1442 = dma.done.wait (%p1845_p10), %s250_s30, 2048  }
  0x3f   : > { %1444 = vsyncadd (%p1845_p10), %s250_s30, 4294965248 }
  0x40   : > { %1446 = dma.done.wait (%p1543_p1), [#allocation7], 1024  }
  0x41   : > { %1448 = vsyncadd (%p1543_p1), [#allocation7], 4294966272  ;;  %v1313_v0 = vld [vmem:[#allocation6 + $0x38] sm:$0xff]   ;;  %v1314_v1 = vld [vmem:[#allocation6 + $0x30] sm:$0xff]   ;;  %s1114_s8 = sshll.u32 %s1630_s21, 8  ;;  %s1147_s10 = sshll.u32 %s1467_s18, 12 }
  0x42   : > { %1172 = vmatprep.subr.bf16.mxu0 %v1313_v0  ;;  %1220 = vmatprep.subr.bf16.mxu1 %v1313_v0  ;;  %v1315_v2 = vld [vmem:[#allocation6 + $0x28] sm:$0xff]   ;;  %v1316_v3 = vld [vmem:[#allocation6 + $0x20] sm:$0xff]   ;;  %v1317_v6 = vld [vmem:[#allocation6 + $0x18] sm:$0xff]   ;;  %s1681_s9 = scalar_lea.vmem [#allocation8], %s1114_s8  ;;  %s1770_s18 = scalar_lea.hbm %s1828_s4, %s1147_s10 }
  0x43   : > { %1173 = vmatpush3.bf16.msra.mxu0 %v1313_v0  ;;  %1228 = vmatpush3.bf16.msra.mxu1 %v1313_v0  ;;  %v1321_v4 = vld [vmem:[%s1634_s6] sm:$0xff]   ;;  %v1318_v7 = vld [vmem:[#allocation6 + $0x10] sm:$0xff]   ;;  %v1319_v8 = vld [vmem:[#allocation6 + $0x8] sm:$0xff]   ;;  %s975_s24 = sshll.u32 %s1681_s9, 4  ;;  %s961_s29 = scalar_lea.sflag [#allocation5], %s1630_s21  ;;  %s1772_s24 = int_to_ptr.vmem [resolvable:$true] %s975_s24 }
  0x44   : > { %1174 = vmatprep.subr.bf16.mxu0 %v1314_v1  ;;  %1221 = vmatprep.subr.bf16.mxu1 %v1314_v1  ;;  %v1322_v5 = vld [vmem:[%s1634_s6 + $0x40] sm:$0xff]   ;;  %v1323_v10 = vld [vmem:[%s1634_s6 + $0x8] sm:$0xff]   ;;  %v1325_v12 = vld [vmem:[%s1634_s6 + $0x10] sm:$0xff]   ;;  %s1391_s12 = scalar_lea.vmem %s1772_s24, 4096  ;;  %s1481_s22 = smov [#allocation8]  }
  0x45   : > { %1188 = vmatprep.mubr.bf16.mxu0 %v1321_v4  ;;  %1204 = vmatprep.mubr.bf16.mxu1 %v1322_v5  ;;  %v1320_v9 = vld [vmem:[#allocation6] sm:$0xff]   ;;  %v1324_v11 = vld [vmem:[%s1634_s6 + $0x48] sm:$0xff]   ;;  %v1326_v13 = vld [vmem:[%s1634_s6 + $0x50] sm:$0xff]   ;;  %p1392_p1 = scmp.ne.s32.totalorder %s1772_s24, %s1391_s12  ;;  %s1395_s1 = sshll.u32 %s1481_s22, 4  ;;  %s1396_s1 = int_to_ptr.vmem [resolvable:$false] %s1395_s1 }
  0x46   : > { %v1327_v14 = vld [vmem:[%s1634_s6 + $0x18] sm:$0xff]   ;;  %v1329_v16 = vld [vmem:[%s1634_s6 + $0x20] sm:$0xff]   ;;  %v1331_v18 = vld [vmem:[%s1634_s6 + $0x28] sm:$0xff]   ;;  %s1397_s30 = scalar_lea.vmem %s1396_s1, 8192  ;;  %p1398_p0 = scmp.lt.s32.totalorder %s1772_s24, %s1396_s1 }
  0x47   : > { %1175 = vmatpush3.bf16.msra.mxu0 %v1314_v1  ;;  %1229 = vmatpush3.bf16.msra.mxu1 %v1314_v1  ;;  %v1328_v15 = vld [vmem:[%s1634_s6 + $0x58] sm:$0xff]   ;;  %v1330_v17 = vld [vmem:[%s1634_s6 + $0x60] sm:$0xff]   ;;  %v1332_v19 = vld [vmem:[%s1634_s6 + $0x68] sm:$0xff]   ;;  %p1393_p8 = pnand %p1392_p1, %p1599_p13  ;;  %p1399_p2 = scmp.lt.s32.totalorder %s1397_s30, %s1391_s12 }
  0x48   : > { %1176 = vmatprep.subr.bf16.mxu0 %v1315_v2  ;;  %1222 = vmatprep.subr.bf16.mxu1 %v1315_v2  ;;  %v1333_v20 = vld [vmem:[%s1634_s6 + $0x30] sm:$0xff]   ;;  %v1335_v22 = vld [vmem:[%s1634_s6 + $0x38] sm:$0xff]   ;;  %v1663_v24 = vld [vmem:[%s1826_s2] ss:$0 sm:$0xff] }
  0x49   : > { %v1334_v21 = vld [vmem:[%s1634_s6 + $0x70] sm:$0xff]   ;;  %v1336_v23 = vld [vmem:[%s1634_s6 + $0x78] sm:$0xff]   ;;  %v1668_v26 = vld [vmem:[%s1827_s3] ss:$0 sm:$0xff]  ;;  %p1394_p12 = pneg %p1393_p8  ;;  %p1400_p3 = por %p1399_p2, %p1398_p0 }
  0x4b   : > { %1177 = vmatpush3.bf16.msra.mxu0 %v1315_v2  ;;  %1230 = vmatpush3.bf16.msra.mxu1 %v1315_v2  ;;  %p1401_p5 = pnand %p1400_p3, %p1394_p12 }
  0x4c   : > { %1178 = vmatprep.subr.bf16.mxu0 %v1316_v3  ;;  %1223 = vmatprep.subr.bf16.mxu1 %v1316_v3 }
  0x4f   : > { %1179 = vmatpush3.bf16.msra.mxu0 %v1316_v3  ;;  %1231 = vmatpush3.bf16.msra.mxu1 %v1316_v3 }
  0x50   : > { %1180 = vmatprep.subr.bf16.mxu0 %v1317_v6  ;;  %1224 = vmatprep.subr.bf16.mxu1 %v1317_v6 }
  0x53   : > { %1181 = vmatpush3.bf16.msra.mxu0 %v1317_v6  ;;  %1232 = vmatpush3.bf16.msra.mxu1 %v1317_v6 }
  0x54   : > { %1182 = vmatprep.subr.bf16.mxu0 %v1318_v7  ;;  %1225 = vmatprep.subr.bf16.mxu1 %v1318_v7 }
  0x57   : > { %1183 = vmatpush3.bf16.msra.mxu0 %v1318_v7  ;;  %1233 = vmatpush3.bf16.msra.mxu1 %v1318_v7 }
  0x58   : > { %1184 = vmatprep.subr.bf16.mxu0 %v1319_v8  ;;  %1226 = vmatprep.subr.bf16.mxu1 %v1319_v8 }
  0x5b   : > { %1185 = vmatpush3.bf16.msra.mxu0 %v1319_v8  ;;  %1234 = vmatpush3.bf16.msra.mxu1 %v1319_v8 }
  0x5c   : > { %1186 = vmatprep.subr.bf16.mxu0 %v1320_v9  ;;  %1227 = vmatprep.subr.bf16.mxu1 %v1320_v9 }
  0x5f   : > { %1187 = vmatpush3.bf16.msra.mxu0 %v1320_v9  ;;  %1235 = vmatpush3.bf16.msra.mxu1 %v1320_v9 }
  0x62   : > { %1189 = vmatmul.mubr.bf16.vlgmr.msra.gmra.mxu0 %v1323_v10  ;;  %1205 = vmatmul.mubr.bf16.vlgmr.msra.gmra.mxu1 %v1324_v11 }
  0x63   : > { %1192 = vmatprep.mubr.bf16.mxu0 %v1325_v12  ;;  %1208 = vmatprep.mubr.bf16.mxu1 %v1326_v13 }
  0x6a   : > { %1193 = vmatmul.mubr.bf16.gmra.mxu0 %v1327_v14  ;;  %1209 = vmatmul.mubr.bf16.gmra.mxu1 %v1328_v15 }
  0x6b   : > { %1196 = vmatprep.mubr.bf16.mxu0 %v1329_v16  ;;  %1212 = vmatprep.mubr.bf16.mxu1 %v1330_v17 }
  0x72   : > { %1197 = vmatmul.mubr.bf16.gmra.mxu0 %v1331_v18  ;;  %1213 = vmatmul.mubr.bf16.gmra.mxu1 %v1332_v19 }
  0x73   : > { %1200 = vmatprep.mubr.bf16.mxu0 %v1333_v20  ;;  %1216 = vmatprep.mubr.bf16.mxu1 %v1334_v21 }
  0x7a   : > { %1201 = vmatmul.mubr.bf16.gmra.mxu0 %v1335_v22  ;;  %1217 = vmatmul.mubr.bf16.gmra.mxu1 %v1336_v23 }
 0x122   : > { %v1190_v25 = vpop.f32.mrf.mxu0  ;;  %v1206_v27 = vpop.f32.mrf.mxu1 }
 0x123   : > { %v827_v28 = vmul.f32 %v1190_v25, %v1663_v24  ;;  %v843_v29 = vmul.f32 %v1206_v27, %v1663_v24 }
 0x124   : > { %v592_v30 = vpop.f32.mrf.mxu0  ;;  %v656_v31 = vpop.f32.mrf.mxu1 }
 0x125   : > { %v866_v32 = vadd.f32 %v1668_v26, %v827_v28  ;;  %v882_v33 = vadd.f32 %v1668_v26, %v843_v29  ;;  %v825_v34 = vmul.f32 %v1663_v24, %v592_v30  ;;  %v841_v35 = vmul.f32 %v1663_v24, %v656_v31 }
 0x126   : > { %v1191_v36 = vpop.f32.mrf.mxu0  ;;  %v1207_v37 = vpop.f32.mrf.mxu1 }
 0x127   : > { %v898_v38 = vmax.f32 %v866_v32, 0.0  ;;  %v914_v39 = vmax.f32 %v882_v33, 0.0  ;;  %v864_v40 = vadd.f32 %v1668_v26, %v825_v34  ;;  %v880_v41 = vadd.f32 %v1668_v26, %v841_v35 }
 0x128   : > { %v828_v42 = vmul.f32 %v1191_v36, %v1663_v24  ;;  %v844_v43 = vmul.f32 %v1207_v37, %v1663_v24  ;;  %v595_v44 = vpop.f32.mrf.mxu0  ;;  %v659_v45 = vpop.f32.mrf.mxu1 }
 0x129   : > { %930 = vst [vmem:[%s1681_s9 + $0x10] sm:$0xff] %v898_v38  ;;  %946 = vst [vmem:[%s1681_s9 + $0x90] sm:$0xff] %v914_v39  ;;  %v896_v46 = vmax.f32 %v864_v40, 0.0  ;;  %v912_v47 = vmax.f32 %v880_v41, 0.0  ;;  %v826_v48 = vmul.f32 %v1663_v24, %v595_v44  ;;  %v842_v49 = vmul.f32 %v1663_v24, %v659_v45 }
 0x12a   : > { %v867_v50 = vadd.f32 %v1668_v26, %v828_v42  ;;  %v883_v51 = vadd.f32 %v1668_v26, %v844_v43  ;;  %v1194_v52 = vpop.f32.mrf.mxu0  ;;  %v1210_v53 = vpop.f32.mrf.mxu1 }
 0x12b   : > { %928 = vst [vmem:[%s1681_s9] sm:$0xff] %v896_v46  ;;  %944 = vst [vmem:[%s1681_s9 + $0x80] sm:$0xff] %v912_v47  ;;  %v865_v54 = vadd.f32 %v1668_v26, %v826_v48  ;;  %v881_v55 = vadd.f32 %v1668_v26, %v842_v49  ;;  %v831_v56 = vmul.f32 %v1194_v52, %v1663_v24 }
 0x12c   : > { %v847_v57 = vmul.f32 %v1210_v53, %v1663_v24  ;;  %v899_v58 = vmax.f32 %v867_v50, 0.0  ;;  %v915_v59 = vmax.f32 %v883_v51, 0.0  ;;  %v608_v60 = vpop.f32.mrf.mxu0  ;;  %v672_v61 = vpop.f32.mrf.mxu1 }
 0x12d   : > { %v897_v62 = vmax.f32 %v865_v54, 0.0  ;;  %v913_v63 = vmax.f32 %v881_v55, 0.0  ;;  %v870_v0 = vadd.f32 %v1668_v26, %v831_v56  ;;  %v829_v2 = vmul.f32 %v1663_v24, %v608_v60 }
 0x12e   : > { %v886_v1 = vadd.f32 %v1668_v26, %v847_v57  ;;  %931 = vst [vmem:[%s1681_s9 + $0x18] sm:$0xff] %v899_v58  ;;  %947 = vst [vmem:[%s1681_s9 + $0x98] sm:$0xff] %v915_v59  ;;  %v845_v3 = vmul.f32 %v1663_v24, %v672_v61  ;;  %v1195_v4 = vpop.f32.mrf.mxu0  ;;  %v1211_v5 = vpop.f32.mrf.mxu1 }
 0x12f   : > { %929 = vst [vmem:[%s1681_s9 + $0x8] sm:$0xff] %v897_v62  ;;  %945 = vst [vmem:[%s1681_s9 + $0x88] sm:$0xff] %v913_v63  ;;  %v902_v6 = vmax.f32 %v870_v0, 0.0  ;;  %v832_v8 = vmul.f32 %v1195_v4, %v1663_v24  ;;  %v848_v9 = vmul.f32 %v1211_v5, %v1663_v24  ;;  %v868_v10 = vadd.f32 %v1668_v26, %v829_v2 }
 0x130   : > { %v918_v7 = vmax.f32 %v886_v1, 0.0  ;;  %v884_v11 = vadd.f32 %v1668_v26, %v845_v3  ;;  %v611_v12 = vpop.f32.mrf.mxu0  ;;  %v675_v13 = vpop.f32.mrf.mxu1 }
 0x131   : > { %934 = vst [vmem:[%s1681_s9 + $0x30] sm:$0xff] %v902_v6  ;;  %v871_v14 = vadd.f32 %v1668_v26, %v832_v8  ;;  %v887_v15 = vadd.f32 %v1668_v26, %v848_v9  ;;  %v830_v16 = vmul.f32 %v1663_v24, %v611_v12  ;;  %v846_v17 = vmul.f32 %v1663_v24, %v675_v13 }
 0x132   : > { %950 = vst [vmem:[%s1681_s9 + $0xb0] sm:$0xff] %v918_v7  ;;  %v900_v18 = vmax.f32 %v868_v10, 0.0  ;;  %v916_v19 = vmax.f32 %v884_v11, 0.0  ;;  %v1198_v20 = vpop.f32.mrf.mxu0  ;;  %v1214_v21 = vpop.f32.mrf.mxu1 }
 0x133   : > { %v903_v22 = vmax.f32 %v871_v14, 0.0  ;;  %v919_v23 = vmax.f32 %v887_v15, 0.0  ;;  %v869_v25 = vadd.f32 %v1668_v26, %v830_v16  ;;  %v885_v27 = vadd.f32 %v1668_v26, %v846_v17 }
 0x134   : > { %932 = vst [vmem:[%s1681_s9 + $0x20] sm:$0xff] %v900_v18  ;;  %948 = vst [vmem:[%s1681_s9 + $0xa0] sm:$0xff] %v916_v19  ;;  %v835_v28 = vmul.f32 %v1198_v20, %v1663_v24  ;;  %v851_v29 = vmul.f32 %v1214_v21, %v1663_v24  ;;  %v624_v30 = vpop.f32.mrf.mxu0  ;;  %v688_v31 = vpop.f32.mrf.mxu1 }
 0x135   : > { %935 = vst [vmem:[%s1681_s9 + $0x38] sm:$0xff] %v903_v22  ;;  %951 = vst [vmem:[%s1681_s9 + $0xb8] sm:$0xff] %v919_v23  ;;  %v901_v32 = vmax.f32 %v869_v25, 0.0  ;;  %v917_v33 = vmax.f32 %v885_v27, 0.0  ;;  %v833_v34 = vmul.f32 %v1663_v24, %v624_v30  ;;  %v849_v35 = vmul.f32 %v1663_v24, %v688_v31 }
 0x136   : > { %v874_v36 = vadd.f32 %v1668_v26, %v835_v28  ;;  %v890_v37 = vadd.f32 %v1668_v26, %v851_v29  ;;  %v1199_v38 = vpop.f32.mrf.mxu0  ;;  %v1215_v39 = vpop.f32.mrf.mxu1 }
 0x137   : > { %933 = vst [vmem:[%s1681_s9 + $0x28] sm:$0xff] %v901_v32  ;;  %949 = vst [vmem:[%s1681_s9 + $0xa8] sm:$0xff] %v917_v33  ;;  %v872_v40 = vadd.f32 %v1668_v26, %v833_v34  ;;  %v888_v41 = vadd.f32 %v1668_v26, %v849_v35  ;;  %v836_v42 = vmul.f32 %v1199_v38, %v1663_v24 }
 0x138   : > { %v852_v43 = vmul.f32 %v1215_v39, %v1663_v24  ;;  %v906_v44 = vmax.f32 %v874_v36, 0.0  ;;  %v922_v45 = vmax.f32 %v890_v37, 0.0  ;;  %v627_v46 = vpop.f32.mrf.mxu0  ;;  %v691_v47 = vpop.f32.mrf.mxu1 }
 0x139   : > { %v904_v48 = vmax.f32 %v872_v40, 0.0  ;;  %v920_v49 = vmax.f32 %v888_v41, 0.0  ;;  %v875_v50 = vadd.f32 %v1668_v26, %v836_v42  ;;  %v834_v52 = vmul.f32 %v1663_v24, %v627_v46 }
 0x13a   : > { %v891_v51 = vadd.f32 %v1668_v26, %v852_v43  ;;  %938 = vst [vmem:[%s1681_s9 + $0x50] sm:$0xff] %v906_v44  ;;  %954 = vst [vmem:[%s1681_s9 + $0xd0] sm:$0xff] %v922_v45  ;;  %v850_v53 = vmul.f32 %v1663_v24, %v691_v47  ;;  %v1202_v54 = vpop.f32.mrf.mxu0  ;;  %v1218_v55 = vpop.f32.mrf.mxu1 }
 0x13b   : > { %936 = vst [vmem:[%s1681_s9 + $0x40] sm:$0xff] %v904_v48  ;;  %952 = vst [vmem:[%s1681_s9 + $0xc0] sm:$0xff] %v920_v49  ;;  %v907_v56 = vmax.f32 %v875_v50, 0.0  ;;  %v839_v58 = vmul.f32 %v1202_v54, %v1663_v24  ;;  %v855_v59 = vmul.f32 %v1218_v55, %v1663_v24  ;;  %v873_v60 = vadd.f32 %v1668_v26, %v834_v52 }
 0x13c   : > { %v923_v57 = vmax.f32 %v891_v51, 0.0  ;;  %v889_v61 = vadd.f32 %v1668_v26, %v850_v53  ;;  %v640_v62 = vpop.f32.mrf.mxu0  ;;  %v704_v63 = vpop.f32.mrf.mxu1 }
 0x13d   : > { %939 = vst [vmem:[%s1681_s9 + $0x58] sm:$0xff] %v907_v56  ;;  %v878_v0 = vadd.f32 %v1668_v26, %v839_v58  ;;  %v894_v1 = vadd.f32 %v1668_v26, %v855_v59  ;;  %v837_v2 = vmul.f32 %v1663_v24, %v640_v62  ;;  %v853_v3 = vmul.f32 %v1663_v24, %v704_v63 }
 0x13e   : > { %955 = vst [vmem:[%s1681_s9 + $0xd8] sm:$0xff] %v923_v57  ;;  %v905_v4 = vmax.f32 %v873_v60, 0.0  ;;  %v921_v5 = vmax.f32 %v889_v61, 0.0  ;;  %v1203_v6 = vpop.f32.mrf.mxu0  ;;  %v1219_v7 = vpop.f32.mrf.mxu1 }
 0x13f   : > { %v910_v8 = vmax.f32 %v878_v0, 0.0  ;;  %v926_v9 = vmax.f32 %v894_v1, 0.0  ;;  %v876_v10 = vadd.f32 %v1668_v26, %v837_v2  ;;  %v892_v11 = vadd.f32 %v1668_v26, %v853_v3 }
 0x140   : > { %937 = vst [vmem:[%s1681_s9 + $0x48] sm:$0xff] %v905_v4  ;;  %953 = vst [vmem:[%s1681_s9 + $0xc8] sm:$0xff] %v921_v5  ;;  %v840_v12 = vmul.f32 %v1203_v6, %v1663_v24  ;;  %v856_v13 = vmul.f32 %v1219_v7, %v1663_v24  ;;  %v643_v14 = vpop.f32.mrf.mxu0  ;;  %v707_v15 = vpop.f32.mrf.mxu1 }
 0x141   : > { %942 = vst [vmem:[%s1681_s9 + $0x70] sm:$0xff] %v910_v8  ;;  %958 = vst [vmem:[%s1681_s9 + $0xf0] sm:$0xff] %v926_v9  ;;  %v908_v16 = vmax.f32 %v876_v10, 0.0  ;;  %v924_v17 = vmax.f32 %v892_v11, 0.0  ;;  %v838_v18 = vmul.f32 %v1663_v24, %v643_v14  ;;  %v854_v19 = vmul.f32 %v1663_v24, %v707_v15 }
 0x142   : > { %v879_v20 = vadd.f32 %v1668_v26, %v840_v12  ;;  %v895_v21 = vadd.f32 %v1668_v26, %v856_v13 }
 0x143   : > { %940 = vst [vmem:[%s1681_s9 + $0x60] sm:$0xff] %v908_v16  ;;  %956 = vst [vmem:[%s1681_s9 + $0xe0] sm:$0xff] %v924_v17  ;;  %v877_v22 = vadd.f32 %v1668_v26, %v838_v18  ;;  %v893_v23 = vadd.f32 %v1668_v26, %v854_v19 }
 0x144   : > { %v911_v25 = vmax.f32 %v879_v20, 0.0  ;;  %v927_v27 = vmax.f32 %v895_v21, 0.0 }
 0x145   : > { %v909_v24 = vmax.f32 %v877_v22, 0.0  ;;  %v925_v28 = vmax.f32 %v893_v23, 0.0 }
 0x146   : > { %943 = vst [vmem:[%s1681_s9 + $0x78] sm:$0xff] %v911_v25  ;;  %959 = vst [vmem:[%s1681_s9 + $0xf8] sm:$0xff] %v927_v27 }
 0x147   : > { %941 = vst [vmem:[%s1681_s9 + $0x68] sm:$0xff] %v909_v24  ;;  %957 = vst [vmem:[%s1681_s9 + $0xe8] sm:$0xff] %v925_v28 }
 0x148   : > { %1404 = shalt.err (!%p1401_p5)
}
 0x149   : > { %s1405_s6 = scalar_lea.hbm %s1770_s18, 4096  ;;  %s1409_s27 = scalar_lea.hbm %s1828_s4, 8192 }
 0x14a   : > { %p1406_p7 = scmp.ne.s32.totalorder %s1770_s18, %s1405_s6  ;;  %p1410_p9 = scmp.lt.s32.totalorder %s1770_s18, %s1828_s4 }
 0x14b   : > { %p1411_p11 = scmp.lt.s32.totalorder %s1409_s27, %s1405_s6 }
 0x14c   : > { %p1407_p4 = pnand %p1406_p7, %p1599_p13 }
 0x14d   : > { %p1412_p10 = por %p1411_p11, %p1410_p9 }
 0x14e   : > { %p1408_p6 = pneg %p1407_p4 }
 0x150   : > { %p1413_p1 = pnand %p1412_p10, %p1408_p6 }
 0x152   : > { %1416 = shalt.err (!%p1413_p1)
}
 0x153   : > { %s1482_s9 = smov 128   ;;  %s1483_s10 = smov 8  }
 0x154   : > { %1242 = dma.vmem_to_hbm [thread:$0]  (%p1599_p13), %s1772_s24, 4096, %s1770_s18, %s961_s29, %s1482_s9, %s1482_s9, %s1483_s10  }
 0x155 PF: > { %s990_s14 = sand.u32 1, %s1455_s15   ;;  %p1846_p8 = scmp.ne.s32.totalorder %s1836_s26, 0 }
 0x156   : > { %p1847_p12 = scmp.ge.s32.totalorder %s1475_s20, 2  ;;  %s991_s11 = scalar_lea.sflag [#allocation5], %s990_s14 }
 0x158   : > { %p1253_p0 = pnand %p1847_p12, %p1846_p8 }
 0x15a   : > { %p1254_p2 = pneg %p1253_p0 }
 0x15c   : > { %1450 = dma.done.wait (%p1254_p2), %s991_s11, 4096  }
 0x15d   : > { %1452 = vsyncadd (%p1254_p2), %s991_s11, 4294963200  ;;  %s21_s20 = sadd.s32 1, %s1475_s20   ;;  %s1848_s15 = smov %s1459_s16 }
 0x15e   : > { %p18_p3 = scmp.ge.s32.totalorder %s21_s20, 4   ;;  %s1849_s16 = smov %s1463_s17 }
 0x15f   : > { %s1850_s17 = smov %s1608_s28  ;;  %s1851_s18 = smov %s1471_s19 }
 0x160   : > { %s1852_s19 = smov %s1854_s5  ;;  %20 = sbr.rel (!%p18_p3) target bundleno = 9 (0x9), region = 100 }
 0x165   :  { %996 = vsyncpa [#allocation4], 1 }
 0x166   :  { %998 = vsyncpa [#allocation4 + $0x1], 1 }
 0x167   :  { %999 = vsyncpa [#allocation7], 1 }
 0x168   :  { %1000 = vsyncpa [#allocation5], 1 }
 0x169   :  { %1002 = vsyncpa [#allocation5 + $0x1], 1 }

</bundles_post_ra>
